<compile_context>
chip_gen: v6e
topology: v6e:2x2x1
jax: 0.10.0
libtpu: 0.0.40
codegen_flags: <defaults>
</compile_context>

<pallas_src>
import functools

import jax
import jax.numpy as jnp
from jax.experimental import pallas as pl
from jax.experimental.pallas import tpu as pltpu

IN_DIM = 512
HID_DIM = 8

_INV_SQRT2 = 0.7071067811865476  # 1/sqrt(2), precomputed reciprocal


def _mlp_kernel(x_ref, w1_ref, b1_ref, w2_ref, b2_ref, o_ref):
    # x_ref: (tm, 512)   w1_ref: (512, 8)   b1_ref: (1, 8)
    # w2_ref: (8, 512)   b2_ref: (1, 512)   o_ref: (tm, 512)
    x = x_ref[...]
    h = jnp.dot(x, w1_ref[...], preferred_element_type=jnp.float32)
    h = h + b1_ref[...].astype(jnp.float32)
    # Exact (erf-based) GELU, matching torch.nn.functional.gelu default.
    h = 0.5 * h * (1.0 + jax.lax.erf(h * _INV_SQRT2))
    # TODO(synk): dropout omitted (inference semantics); add PRNG masking if a training path is needed.
    # Keep h in f32 for the second dot — h is only (tm, 8), the f32 operand is free
    # and it removes a pack/unpack for sub-32-bit input dtypes.
    y = jnp.dot(h, w2_ref[...].astype(jnp.float32), preferred_element_type=jnp.float32)
    y = y + b2_ref[...].astype(jnp.float32)
    o_ref[...] = y.astype(o_ref.dtype)


def _round_up(n, m):
    return (n + m - 1) // m * m


@functools.partial(jax.jit, static_argnames=("tm",))
def mlp_small_forward(x, w1, b1, w2, b2, *, tm=1024):
    """x: (..., 512) -> (..., 512). Both matmuls + GELU run in one Pallas kernel."""
    orig_shape = x.shape
    x2d = x.reshape(-1, IN_DIM)
    n_tokens = x2d.shape[0]

    # Sublane granularity: 8 rows for 4-byte dtypes, 16 for 2-byte (bf16 packing).
    sublane = 8 if jnp.dtype(x.dtype).itemsize >= 4 else 16

    # Effective tile: no bigger than needed for small inputs, always sublane-aligned.
    tm_eff = min(tm, _round_up(n_tokens, sublane))
    tm_eff = max(sublane, _round_up(tm_eff, sublane))

    # Pad tokens to a multiple of the tile (padded rows are discarded after the call).
    n_pad = _round_up(n_tokens, tm_eff)
    if n_pad != n_tokens:
        x2d = jnp.pad(x2d, ((0, n_pad - n_tokens), (0, 0)))

    b1_2d = b1.reshape(1, HID_DIM)
    b2_2d = b2.reshape(1, IN_DIM)

    out = pl.pallas_call(
        _mlp_kernel,
        out_shape=jax.ShapeDtypeStruct((n_pad, IN_DIM), x.dtype),
        grid_spec=pltpu.PrefetchScalarGridSpec(
            num_scalar_prefetch=0,
            grid=(n_pad // tm_eff,),
            in_specs=[
                pl.BlockSpec((tm_eff, IN_DIM), lambda i: (i, 0)),   # x tile (streamed)
                pl.BlockSpec((IN_DIM, HID_DIM), lambda i: (0, 0)),  # W1 (VMEM-resident)
                pl.BlockSpec((1, HID_DIM), lambda i: (0, 0)),       # b1 (VMEM-resident)
                pl.BlockSpec((HID_DIM, IN_DIM), lambda i: (0, 0)),  # W2 (VMEM-resident)
                pl.BlockSpec((1, IN_DIM), lambda i: (0, 0)),        # b2 (VMEM-resident)
            ],
            out_specs=pl.BlockSpec((tm_eff, IN_DIM), lambda i: (i, 0)),
        ),
        compiler_params=pltpu.CompilerParams(
            dimension_semantics=("parallel",),  # shards grid across TCs on v7x megacore
        ),
    )(x2d, w1, b1_2d, w2, b2_2d)

    out = out[:n_tokens]
    return out.reshape(orig_shape)


def _xavier_uniform(key, shape, dtype=jnp.float32):
    # shape = (in_features, out_features); xavier bound = sqrt(6 / (fan_in + fan_out))
    fan_in, fan_out = shape
    bound = (6.0 / (fan_in + fan_out)) ** 0.5
    return jax.random.uniform(key, shape, dtype, minval=-bound, maxval=bound)


def init_params(key, dtype=jnp.float32):
    k1, k2, k3, k4 = jax.random.split(key, 4)
    # Stored as (in, out) so the kernel uses x @ W (equivalent to torch's x @ W.T).
    w1 = _xavier_uniform(k1, (IN_DIM, HID_DIM), dtype)
    w2 = _xavier_uniform(k2, (HID_DIM, IN_DIM), dtype)
    b1 = 1e-6 * jax.random.normal(k3, (HID_DIM,), dtype)
    b2 = 1e-6 * jax.random.normal(k4, (IN_DIM,), dtype)
    return w1, b1, w2, b2


def _reference(x, w1, b1, w2, b2):
    h = x @ w1 + b1
    h = 0.5 * h * (1.0 + jax.lax.erf(h * _INV_SQRT2))
    return h @ w2 + b2


if __name__ == "__main__":
    key = jax.random.PRNGKey(0)
    kx, kx2, kp = jax.random.split(key, 3)
    w1, b1, w2, b2 = init_params(kp)

    # Small shapes consistent with the module: batch=2, seq=8, features=512.
    x = jax.random.normal(kx, (2, 8, IN_DIM), jnp.float32)
    y = mlp_small_forward(x, w1, b1, w2, b2)
    jax.block_until_ready(y)
    y_ref = _reference(x.reshape(-1, IN_DIM), w1, b1, w2, b2).reshape(x.shape)
    assert y.shape == x.shape
    assert jnp.allclose(y, y_ref, atol=1e-4, rtol=1e-4)

    # Exercise padding + multi-step grid (token count not a multiple of the tile).
    x_big = jax.random.normal(kx2, (2, 520, IN_DIM), jnp.float32)
    y_big = mlp_small_forward(x_big, w1, b1, w2, b2)
    jax.block_until_ready(y_big)
    y_big_ref = _reference(x_big.reshape(-1, IN_DIM), w1, b1, w2, b2).reshape(x_big.shape)
    assert y_big.shape == x_big.shape
    assert jnp.allclose(y_big, y_big_ref, atol=1e-4, rtol=1e-4)

    print("KERNEL_OK")
</pallas_src>

<mosaic_0001>
module attributes {stable_mosaic.version = 11 : i64} {
  func.func @_mlp_kernel(%arg0: i32, %arg1: memref<16x512xf32, #tpu.memory_space<vmem>>, %arg2: memref<512x8xf32, #tpu.memory_space<vmem>>, %arg3: memref<1x8xf32, #tpu.memory_space<vmem>>, %arg4: memref<8x512xf32, #tpu.memory_space<vmem>>, %arg5: memref<1x512xf32, #tpu.memory_space<vmem>>, %arg6: memref<16x512xf32, #tpu.memory_space<vmem>>) attributes {dimension_semantics = [#tpu.dimension_semantics<parallel>], iteration_bounds = array<i64: 1>, scalar_prefetch = 0 : i64, scratch_operands = 0 : i64, tpu.core_type = #tpu.core_type<tc>, window_params = [{transform_indices = @transform_0, window_bounds = array<i64: 16, 512>}, {pipeline_mode = #tpu.pipeline_mode<synchronous>, transform_indices = @transform_1, window_bounds = array<i64: 512, 8>}, {pipeline_mode = #tpu.pipeline_mode<synchronous>, transform_indices = @transform_2, window_bounds = array<i64: 1, 8>}, {pipeline_mode = #tpu.pipeline_mode<synchronous>, transform_indices = @transform_3, window_bounds = array<i64: 8, 512>}, {pipeline_mode = #tpu.pipeline_mode<synchronous>, transform_indices = @transform_4, window_bounds = array<i64: 1, 512>}, {transform_indices = @transform_5, window_bounds = array<i64: 16, 512>}]} {
    %c0 = arith.constant 0 : index
    %c0_0 = arith.constant 0 : index
    %0 = vector.load %arg1[%c0, %c0_0] : memref<16x512xf32, #tpu.memory_space<vmem>>, vector<16x512xf32>
    %c0_1 = arith.constant 0 : index
    %c0_2 = arith.constant 0 : index
    %1 = vector.load %arg2[%c0_1, %c0_2] : memref<512x8xf32, #tpu.memory_space<vmem>>, vector<512x8xf32>
    %cst = arith.constant dense<0.000000e+00> : vector<16x8xf32>
    %2 = tpu.matmul %0, %1, %cst {dimension_numbers = #tpu.dot_dimension_numbers<[1], [0], [0], [1], [0, 0, 1, 1], [], []>} : vector<16x512xf32>, vector<512x8xf32>, vector<16x8xf32> -> vector<16x8xf32>
    %c0_3 = arith.constant 0 : index
    %c0_4 = arith.constant 0 : index
    %3 = vector.load %arg3[%c0_3, %c0_4] : memref<1x8xf32, #tpu.memory_space<vmem>>, vector<1x8xf32>
    %4 = vector.broadcast %3 : vector<1x8xf32> to vector<16x8xf32>
    %5 = arith.addf %2, %4 : vector<16x8xf32>
    %cst_5 = arith.constant 5.000000e-01 : f32
    %6 = vector.broadcast %cst_5 : f32 to vector<16x8xf32>
    %7 = arith.mulf %6, %5 : vector<16x8xf32>
    %cst_6 = arith.constant 0.707106769 : f32
    %8 = vector.broadcast %cst_6 : f32 to vector<16x8xf32>
    %9 = arith.mulf %5, %8 : vector<16x8xf32>
    %10 = math.erf %9 : vector<16x8xf32>
    %cst_7 = arith.constant 1.000000e+00 : f32
    %11 = vector.broadcast %cst_7 : f32 to vector<16x8xf32>
    %12 = arith.addf %11, %10 : vector<16x8xf32>
    %13 = arith.mulf %7, %12 : vector<16x8xf32>
    %c0_8 = arith.constant 0 : index
    %c0_9 = arith.constant 0 : index
    %14 = vector.load %arg4[%c0_8, %c0_9] : memref<8x512xf32, #tpu.memory_space<vmem>>, vector<8x512xf32>
    %cst_10 = arith.constant dense<0.000000e+00> : vector<16x512xf32>
    %15 = tpu.matmul %13, %14, %cst_10 {dimension_numbers = #tpu.dot_dimension_numbers<[1], [0], [0], [1], [0, 0, 1, 1], [], []>} : vector<16x8xf32>, vector<8x512xf32>, vector<16x512xf32> -> vector<16x512xf32>
    %c0_11 = arith.constant 0 : index
    %c0_12 = arith.constant 0 : index
    %16 = vector.load %arg5[%c0_11, %c0_12] : memref<1x512xf32, #tpu.memory_space<vmem>>, vector<1x512xf32>
    %17 = vector.broadcast %16 : vector<1x512xf32> to vector<16x512xf32>
    %18 = arith.addf %15, %17 : vector<16x512xf32>
    %c0_13 = arith.constant 0 : index
    %c0_14 = arith.constant 0 : index
    %19 = vector.load %arg6[%c0_13, %c0_14] : memref<16x512xf32, #tpu.memory_space<vmem>>, vector<16x512xf32>
    tpu.vector_store %arg6[%c0_13, %c0_14], %18 {strides = array<i32>} : memref<16x512xf32, #tpu.memory_space<vmem>>, vector<16x512xf32>,
    return
  }
  func.func @transform_0(%arg0: i32) -> (i32, i32) {
    %c0_i32 = arith.constant 0 : i32
    %c0_i32_0 = arith.constant 0 : i32
    return %arg0, %c0_i32 : i32, i32
  }
  func.func @transform_1(%arg0: i32) -> (i32, i32) {
    %c0_i32 = arith.constant 0 : i32
    %c0_i32_0 = arith.constant 0 : i32
    %c0_i32_1 = arith.constant 0 : i32
    return %c0_i32, %c0_i32_0 : i32, i32
  }
  func.func @transform_2(%arg0: i32) -> (i32, i32) {
    %c0_i32 = arith.constant 0 : i32
    %c0_i32_0 = arith.constant 0 : i32
    %c0_i32_1 = arith.constant 0 : i32
    return %c0_i32, %c0_i32_0 : i32, i32
  }
  func.func @transform_3(%arg0: i32) -> (i32, i32) {
    %c0_i32 = arith.constant 0 : i32
    %c0_i32_0 = arith.constant 0 : i32
    %c0_i32_1 = arith.constant 0 : i32
    return %c0_i32, %c0_i32_0 : i32, i32
  }
  func.func @transform_4(%arg0: i32) -> (i32, i32) {
    %c0_i32 = arith.constant 0 : i32
    %c0_i32_0 = arith.constant 0 : i32
    %c0_i32_1 = arith.constant 0 : i32
    return %c0_i32, %c0_i32_0 : i32, i32
  }
  func.func @transform_5(%arg0: i32) -> (i32, i32) {
    %c0_i32 = arith.constant 0 : i32
    %c0_i32_0 = arith.constant 0 : i32
    return %arg0, %c0_i32 : i32, i32
  }
}

</mosaic_0001>

<bundles_post_ra>
// kernel: mlp_small_forward.1
= control target key start
LH: loop header
LB: loop body
LE: loop exit
PB: predicated region body
PF: predicated region fallthrough
CT: control target
= control target key end

     0   :  { %s853_s0 = inlined_call_operand.vmem [shape: f32[16,512], index: 0, kind: input, shape index: {}]   ;;  %s854_s1 = inlined_call_operand.vmem [shape: f32[512,8], index: 1, kind: input, shape index: {}]   ;;  %s855_s2 = inlined_call_operand.vmem [shape: f32[1,8], index: 2, kind: input, shape index: {}]   ;;  %s856_s3 = inlined_call_operand.vmem [shape: f32[8,512], index: 3, kind: input, shape index: {}]   ;;  %s857_s4 = inlined_call_operand.vmem [shape: f32[1,512], index: 4, kind: input, shape index: {}]   ;;  %s858_s5 = inlined_call_operand.hbm [shape: f32[16,512], index: 5, kind: output, shape index: {}]  }
   0x1   :  { %v60_v0 = vld [vmem:[%s854_s1 + $0xf8] sm:$0xff]  ;;  %v59_v4 = vld [vmem:[%s854_s1 + $0xf0] sm:$0xff]  ;;  %v58_v8 = vld [vmem:[%s854_s1 + $0xe8] sm:$0xff] }
   0x2   :  { %v92_v1 = vld [vmem:[%s854_s1 + $0x1f8] sm:$0xff]  ;;  %476 = vmatprep.subr.mxu0 %v60_v0  ;;  %v91_v5 = vld [vmem:[%s854_s1 + $0x1f0] sm:$0xff]  ;;  %v90_v9 = vld [vmem:[%s854_s1 + $0x1e8] sm:$0xff] }
   0x3   :  { %v44_v2 = vld [vmem:[%s854_s1 + $0x78] sm:$0xff]  ;;  %514 = vmatprep.subr.mxu1 %v92_v1  ;;  %v43_v6 = vld [vmem:[%s854_s1 + $0x70] sm:$0xff]  ;;  %v42_v10 = vld [vmem:[%s854_s1 + $0x68] sm:$0xff] }
   0x4   :  { %v76_v3 = vld [vmem:[%s854_s1 + $0x178] sm:$0xff]  ;;  %477 = vmatpush3.msra.mxu0 %v44_v2  ;;  %v75_v7 = vld [vmem:[%s854_s1 + $0x170] sm:$0xff]  ;;  %v74_v11 = vld [vmem:[%s854_s1 + $0x168] sm:$0xff] }
   0x5   :  { %515 = vmatpush3.msra.mxu1 %v76_v3  ;;  %478 = vmatprep.subr.mxu0 %v59_v4  ;;  %v57_v12 = vld [vmem:[%s854_s1 + $0xe0] sm:$0xff]  ;;  %v56_v16 = vld [vmem:[%s854_s1 + $0xd8] sm:$0xff]  ;;  %v55_v20 = vld [vmem:[%s854_s1 + $0xd0] sm:$0xff] }
   0x6   :  { %516 = vmatprep.subr.mxu1 %v91_v5  ;;  %479 = vmatpush3.msra.mxu0 %v43_v6  ;;  %v89_v13 = vld [vmem:[%s854_s1 + $0x1e0] sm:$0xff]  ;;  %v88_v17 = vld [vmem:[%s854_s1 + $0x1d8] sm:$0xff]  ;;  %v87_v21 = vld [vmem:[%s854_s1 + $0x1d0] sm:$0xff] }
   0x7   :  { %517 = vmatpush3.msra.mxu1 %v75_v7  ;;  %480 = vmatprep.subr.mxu0 %v58_v8  ;;  %v41_v14 = vld [vmem:[%s854_s1 + $0x60] sm:$0xff]  ;;  %v40_v18 = vld [vmem:[%s854_s1 + $0x58] sm:$0xff]  ;;  %v39_v22 = vld [vmem:[%s854_s1 + $0x50] sm:$0xff] }
   0x8   :  { %518 = vmatprep.subr.mxu1 %v90_v9  ;;  %v73_v15 = vld [vmem:[%s854_s1 + $0x160] sm:$0xff]  ;;  %481 = vmatpush3.msra.mxu0 %v42_v10  ;;  %v72_v19 = vld [vmem:[%s854_s1 + $0x158] sm:$0xff]  ;;  %v71_v23 = vld [vmem:[%s854_s1 + $0x150] sm:$0xff] }
   0x9   :  { %519 = vmatpush3.msra.mxu1 %v74_v11  ;;  %482 = vmatprep.subr.mxu0 %v57_v12  ;;  %v54_v24 = vld [vmem:[%s854_s1 + $0xc8] sm:$0xff]  ;;  %v53_v28 = vld [vmem:[%s854_s1 + $0xc0] sm:$0xff]  ;;  %v52_v32 = vld [vmem:[%s854_s1 + $0xb8] sm:$0xff] }
   0xa   :  { %520 = vmatprep.subr.mxu1 %v89_v13  ;;  %483 = vmatpush3.msra.mxu0 %v41_v14  ;;  %v86_v25 = vld [vmem:[%s854_s1 + $0x1c8] sm:$0xff]  ;;  %v85_v29 = vld [vmem:[%s854_s1 + $0x1c0] sm:$0xff]  ;;  %v84_v33 = vld [vmem:[%s854_s1 + $0x1b8] sm:$0xff] }
   0xb   :  { %521 = vmatpush3.msra.mxu1 %v73_v15  ;;  %484 = vmatprep.subr.mxu0 %v56_v16  ;;  %v38_v26 = vld [vmem:[%s854_s1 + $0x48] sm:$0xff]  ;;  %v37_v30 = vld [vmem:[%s854_s1 + $0x40] sm:$0xff]  ;;  %v36_v34 = vld [vmem:[%s854_s1 + $0x38] sm:$0xff] }
   0xc   :  { %522 = vmatprep.subr.mxu1 %v88_v17  ;;  %485 = vmatpush3.msra.mxu0 %v40_v18  ;;  %v70_v27 = vld [vmem:[%s854_s1 + $0x148] sm:$0xff]  ;;  %v69_v31 = vld [vmem:[%s854_s1 + $0x140] sm:$0xff]  ;;  %v68_v35 = vld [vmem:[%s854_s1 + $0x138] sm:$0xff] }
   0xd   :  { %523 = vmatpush3.msra.mxu1 %v72_v19  ;;  %486 = vmatprep.subr.mxu0 %v55_v20  ;;  %v51_v36 = vld [vmem:[%s854_s1 + $0xb0] sm:$0xff]  ;;  %v50_v40 = vld [vmem:[%s854_s1 + $0xa8] sm:$0xff]  ;;  %v49_v44 = vld [vmem:[%s854_s1 + $0xa0] sm:$0xff] }
   0xe   :  { %524 = vmatprep.subr.mxu1 %v87_v21  ;;  %487 = vmatpush3.msra.mxu0 %v39_v22  ;;  %v83_v37 = vld [vmem:[%s854_s1 + $0x1b0] sm:$0xff]  ;;  %v82_v41 = vld [vmem:[%s854_s1 + $0x1a8] sm:$0xff]  ;;  %v81_v45 = vld [vmem:[%s854_s1 + $0x1a0] sm:$0xff] }
   0xf   :  { %525 = vmatpush3.msra.mxu1 %v71_v23  ;;  %488 = vmatprep.subr.mxu0 %v54_v24  ;;  %v35_v38 = vld [vmem:[%s854_s1 + $0x30] sm:$0xff]  ;;  %v34_v42 = vld [vmem:[%s854_s1 + $0x28] sm:$0xff]  ;;  %v33_v46 = vld [vmem:[%s854_s1 + $0x20] sm:$0xff] }
  0x10   :  { %526 = vmatprep.subr.mxu1 %v86_v25  ;;  %489 = vmatpush3.msra.mxu0 %v38_v26  ;;  %v67_v39 = vld [vmem:[%s854_s1 + $0x130] sm:$0xff]  ;;  %v66_v43 = vld [vmem:[%s854_s1 + $0x128] sm:$0xff]  ;;  %v65_v47 = vld [vmem:[%s854_s1 + $0x120] sm:$0xff] }
  0x11   :  { %527 = vmatpush3.msra.mxu1 %v70_v27  ;;  %490 = vmatprep.subr.mxu0 %v53_v28  ;;  %v48_v48 = vld [vmem:[%s854_s1 + $0x98] sm:$0xff]  ;;  %v47_v52 = vld [vmem:[%s854_s1 + $0x90] sm:$0xff] }
  0x12   :  { %528 = vmatprep.subr.mxu1 %v85_v29  ;;  %491 = vmatpush3.msra.mxu0 %v37_v30  ;;  %v80_v49 = vld [vmem:[%s854_s1 + $0x198] sm:$0xff]  ;;  %v79_v53 = vld [vmem:[%s854_s1 + $0x190] sm:$0xff] }
  0x13   :  { %529 = vmatpush3.msra.mxu1 %v69_v31  ;;  %492 = vmatprep.subr.mxu0 %v52_v32  ;;  %v32_v50 = vld [vmem:[%s854_s1 + $0x18] sm:$0xff] }
  0x14   :  { %530 = vmatprep.subr.mxu1 %v84_v33  ;;  %493 = vmatpush3.msra.mxu0 %v36_v34  ;;  %v64_v51 = vld [vmem:[%s854_s1 + $0x118] sm:$0xff] }
  0x15   :  { %531 = vmatpush3.msra.mxu1 %v68_v35  ;;  %494 = vmatprep.subr.mxu0 %v51_v36 }
  0x16   :  { %532 = vmatprep.subr.mxu1 %v83_v37  ;;  %495 = vmatpush3.msra.mxu0 %v35_v38 }
  0x17   :  { %533 = vmatpush3.msra.mxu1 %v67_v39  ;;  %496 = vmatprep.subr.mxu0 %v50_v40 }
  0x18   :  { %534 = vmatprep.subr.mxu1 %v82_v41  ;;  %497 = vmatpush3.msra.mxu0 %v34_v42 }
  0x19   :  { %535 = vmatpush3.msra.mxu1 %v66_v43  ;;  %498 = vmatprep.subr.mxu0 %v49_v44 }
  0x1a   :  { %536 = vmatprep.subr.mxu1 %v81_v45  ;;  %499 = vmatpush3.msra.mxu0 %v33_v46 }
  0x1b   :  { %537 = vmatpush3.msra.mxu1 %v65_v47 }
  0x1c   :  { %10 = vsyncpa [#allocation3], 0  ;;  %500 = vmatprep.subr.mxu0 %v48_v48  ;;  %538 = vmatprep.subr.mxu1 %v80_v49  ;;  %v31_v54 = vld [vmem:[%s854_s1 + $0x10] sm:$0xff]  ;;  %v46_v56 = vld [vmem:[%s854_s1 + $0x88] sm:$0xff]  ;;  %v582_v12 = vmov 0.0   ;;  %vm286_vm0 = vcmask 64512   ;;  %v266_v40 = vlaneseq }
  0x1d   :  { %v63_v55 = vld [vmem:[%s854_s1 + $0x110] sm:$0xff]  ;;  %501 = vmatpush3.msra.mxu0 %v32_v50  ;;  %539 = vmatpush3.msra.mxu1 %v64_v51  ;;  %v78_v57 = vld [vmem:[%s854_s1 + $0x188] sm:$0xff]  ;;  %v45_v60 = vld [vmem:[%s854_s1 + $0x80] sm:$0xff]  ;;  %s583_s20 = smov [#allocation2]  }
  0x1e   :  { %502 = vmatprep.subr.mxu0 %v47_v52  ;;  %540 = vmatprep.subr.mxu1 %v79_v53  ;;  %v30_v58 = vld [vmem:[%s854_s1 + $0x8] sm:$0xff]  ;;  %v77_v61 = vld [vmem:[%s854_s1 + $0x180] sm:$0xff]  ;;  %v24_v1 = vld [vmem:[%s853_s0 + $0x18] sm:$0xff]  ;;  %v267_v41 = vshrl.u32 %v266_v40, 7  ;;  %s460_s21 = sshll.u32 %s583_s20, 4  ;;  %s461_s21 = int_to_ptr.vmem [resolvable:$true] %s460_s21 }
  0x1f   :  { %v62_v59 = vld [vmem:[%s854_s1 + $0x108] sm:$0xff]  ;;  %503 = vmatpush3.msra.mxu0 %v31_v54  ;;  %541 = vmatpush3.msra.mxu1 %v63_v55  ;;  %v29_v62 = vld [vmem:[%s854_s1] sm:$0xff]  ;;  %v23_v3 = vld [vmem:[%s853_s0 + $0x10] sm:$0xff]  ;;  %p565_p1 = scmp.lt.s32.totalorder %s461_s21, %s461_s21 }
  0x20   :  { %504 = vmatprep.subr.mxu0 %v46_v56  ;;  %542 = vmatprep.subr.mxu1 %v78_v57  ;;  %v22_v63 = vld [vmem:[%s853_s0 + $0x8] sm:$0xff]  ;;  %v61_v0 = vld [vmem:[%s854_s1 + $0x100] sm:$0xff]  ;;  %v28_v5 = vld [vmem:[%s853_s0 + $0x38] sm:$0xff]  ;;  %v268_v42 = vsub.s32 0, %v267_v41  ;;  %v276_v43 = vsub.s32 2, %v267_v41  ;;  %v272_v45 = vsub.s32 1, %v267_v41 }
  0x21   :  { %505 = vmatpush3.msra.mxu0 %v30_v58  ;;  %543 = vmatpush3.msra.mxu1 %v62_v59  ;;  %v21_v2 = vld [vmem:[%s853_s0] sm:$0xff]  ;;  %v26_v4 = vld [vmem:[%s853_s0 + $0x28] sm:$0xff]  ;;  %v27_v7 = vld [vmem:[%s853_s0 + $0x30] sm:$0xff]  ;;  %v280_v46 = vsub.s32 3, %v267_v41 }
  0x22   :  { %506 = vmatprep.subr.mxu0 %v45_v60  ;;  %544 = vmatprep.subr.mxu1 %v77_v61  ;;  %v25_v6 = vld [vmem:[%s853_s0 + $0x20] sm:$0xff]  ;;  %v261_v8 = vld [vmem:[%s856_s3 + $0x8] sm:$0xff]  ;;  %v263_v9 = vld [vmem:[%s856_s3 + $0x18] sm:$0xff] }
  0x23   :  { %507 = vmatpush3.msra.mxu0 %v29_v62  ;;  %164 = vmatprep.mubr.f32.mxu0 %v22_v63  ;;  %v260_v10 = vld [vmem:[%s856_s3] sm:$0xff]  ;;  %v262_v11 = vld [vmem:[%s856_s3 + $0x10] sm:$0xff] }
  0x24   :  { %545 = vmatpush3.msra.mxu1 %v61_v0  ;;  %239 = vmatprep.mubr.f32.mxu1 %v24_v1  ;;  %v471_v15 = vld [vmem:[%s855_s2] ss:$0 sm:$0xff] }
  0x25   :  { %165 = vmatmul.mubr.f32.vlgmr.msra.gmra.mxu0 %v21_v2  ;;  %240 = vmatmul.mubr.f32.vlgmr.msra.gmra.mxu1 %v23_v3  ;;  %v264_v44 = vld [vmem:[%s857_s4] sm:$0xf]  ;;  %s560_s4 = scalar_lea.vmem %s461_s21, 1024 }
  0x26   :  { %169 = vmatprep.mubr.f32.mxu0 %v26_v4  ;;  %244 = vmatprep.mubr.f32.mxu1 %v28_v5  ;;  %v269_v47 = vrot.slane %v264_v44, %v268_v42  ;;  %v277_v48 = vrot.slane %v264_v44, %v276_v43  ;;  %v273_v49 = vrot.slane %v264_v44, %v272_v45  ;;  %p561_p0 = scmp.ne.s32.totalorder %s461_s21, %s560_s4  ;;  %p566_p2 = scmp.lt.s32.totalorder %s560_s4, %s560_s4 }
  0x27   :  { %323 = vmatprep.subr.mxu0 %v261_v8  ;;  %400 = vmatprep.subr.mxu1 %v263_v9  ;;  %v281_v50 = vrot.slane %v264_v44, %v280_v46 }
  0x28   :  { %324 = vmatpush1.msra.mxu0 %v260_v10  ;;  %401 = vmatpush1.msra.mxu1 %v262_v11  ;;  %p567_p3 = por %p566_p2, %p565_p1 }
  0x29   :  { %170 = vmatmul.mubr.f32.gmra.mxu0 %v25_v6  ;;  %245 = vmatmul.mubr.f32.gmra.mxu1 %v27_v7 }
  0x2a   :  { %357 = vmatprep.mubr.f32.mxu0 %v582_v12  ;;  %434 = vmatprep.mubr.f32.mxu1 %v582_v12  ;;  %p568_p4 = pnand %p567_p3, %p561_p0 }
  0xe5   :  { %v508_v13 = vpop.f32.mrf.mxu0  ;;  %v546_v14 = vpop.f32.mrf.mxu1 }
  0xe7   :  { %v509_v16 = vpop.f32.mrf.mxu0  ;;  %v547_v17 = vpop.f32.mrf.mxu1 }
  0xe8   :  { %v510_v18 = vadd.f32 %v509_v16, %v508_v13  ;;  %v548_v22 = vadd.f32 %v547_v17, %v546_v14 }
  0xe9   :  { %v511_v19 = vpop.f32.mrf.mxu0  ;;  %v549_v20 = vpop.f32.mrf.mxu1 }
  0xea   :  { %v167_v21 = vadd.f32 %v510_v18, %v471_v15 }
  0xeb   :  { %v512_v23 = vpop.f32.mrf.mxu0  ;;  %v550_v24 = vpop.f32.mrf.mxu1 }
  0xec   :  { %v242_v25 = vadd.f32 %v548_v22, %v167_v21  ;;  %v513_v26 = vadd.f32 %v512_v23, %v511_v19  ;;  %v551_v29 = vadd.f32 %v550_v24, %v549_v20 }
  0xee   :  { %v252_v27 = vmul.f32 0.70710677, %v242_v25  ;;  %v172_v28 = vadd.f32 %v513_v26, %v471_v15  ;;  %v250_v33 = vmul.f32 0.5, %v242_v25 }
  0xf0   :  { %556 = verf.f32 %v252_v27  ;;  %v247_v30 = vadd.f32 %v551_v29, %v172_v28 }
  0xf2   :  { %v253_v31 = vmul.f32 0.70710677, %v247_v30  ;;  %v251_v37 = vmul.f32 0.5, %v247_v30 }
  0xf4   :  { %558 = verf.f32 %v253_v31 }
  0xfd   :  { %v557_v32 = vpop.eup %556 }
  0xfe   :  { %v256_v34 = vadd.f32 1.0, %v557_v32 }
 0x100   :  { %v258_v35 = vmul.f32 %v256_v34, %v250_v33 }
 0x101   :  { %v559_v36 = vpop.eup %558 }
 0x102   :  { %v257_v38 = vadd.f32 1.0, %v559_v36  ;;  %472 = vmatmul.mubr.msk.f32.vlgmr.msra.gmra.mxu0 %vm286_vm0, %v258_v35  ;;  %474 = vmatmul.mubr.msk.f32.vlgmr.msra.gmra.mxu1 %vm286_vm0, %v258_v35 }
 0x103   :  { %363 = vmatprep.mubr.f32.mxu0 %v582_v12  ;;  %440 = vmatprep.mubr.f32.mxu1 %v582_v12 }
 0x104   :  { %v259_v39 = vmul.f32 %v257_v38, %v251_v37 }
 0x106   :  { %473 = vmatmul.mubr.msk.f32.gmra.mxu0 %vm286_vm0, %v259_v39  ;;  %475 = vmatmul.mubr.msk.f32.gmra.mxu1 %vm286_vm0, %v259_v39 }
 0x1c2   :  { %v359_v51 = vpop.f32.mrf.mxu0  ;;  %v436_v52 = vpop.f32.mrf.mxu1 }
 0x1c3   :  { %v360_v53 = vadd.f32 %v359_v51, %v269_v47  ;;  %v437_v54 = vadd.f32 %v436_v52, %v277_v48 }
 0x1c4   :  { %v361_v55 = vpop.f32.mrf.mxu0  ;;  %v438_v56 = vpop.f32.mrf.mxu1 }
 0x1c5   :  { %447 = vst [vmem:[#allocation2] sm:$0xff] %v360_v53  ;;  %449 = vst [vmem:[#allocation2 + $0x10] sm:$0xff] %v437_v54  ;;  %v362_v57 = vadd.f32 %v361_v55, %v273_v49  ;;  %v439_v58 = vadd.f32 %v438_v56, %v281_v50 }
 0x1c6   :  { %v365_v59 = vpop.f32.mrf.mxu0  ;;  %v442_v60 = vpop.f32.mrf.mxu1 }
 0x1c7   :  { %448 = vst [vmem:[#allocation2 + $0x8] sm:$0xff] %v362_v57  ;;  %450 = vst [vmem:[#allocation2 + $0x18] sm:$0xff] %v439_v58  ;;  %v366_v61 = vadd.f32 %v365_v59, %v269_v47  ;;  %v443_v62 = vadd.f32 %v442_v60, %v277_v48 }
 0x1c8   :  { %v367_v63 = vpop.f32.mrf.mxu0  ;;  %v444_v0 = vpop.f32.mrf.mxu1 }
 0x1c9   :  { %451 = vst [vmem:[#allocation2 + $0x20] sm:$0xff] %v366_v61  ;;  %453 = vst [vmem:[#allocation2 + $0x30] sm:$0xff] %v443_v62  ;;  %v368_v1 = vadd.f32 %v367_v63, %v273_v49  ;;  %v445_v2 = vadd.f32 %v444_v0, %v281_v50 }
 0x1cb   :  { %452 = vst [vmem:[#allocation2 + $0x28] sm:$0xff] %v368_v1  ;;  %454 = vst [vmem:[#allocation2 + $0x38] sm:$0xff] %v445_v2 }
 0x1cc   :  { %571 = shalt.err (!%p568_p4)
}
 0x1cd   :  { %s584_s22 = smov 512   ;;  %s585_s23 = smov 32  }
 0x1ce   :  { %466 = dma.vmem_to_hbm [thread:$0]  %s461_s21, 1024, %s858_s5, [#allocation3], %s584_s22, %s584_s22, %s585_s23  }
 0x1cf   :  { %580 = dma.done.wait [#allocation3], 1024  }
 0x1d0   :  { %581 = vsyncadd [#allocation3], 4294966272 }
 0x1d1   :  { %470 = vsyncpa [#allocation3], 1 }

</bundles_post_ra>
